<compile_context>
chip_gen: v7x
topology: tpu7x:2x2x1
jax: 0.10.0
libtpu: 0.0.40
codegen_flags: <defaults>
</compile_context>

<pallas_src>
import functools

import jax
import jax.numpy as jnp
from jax.experimental import pallas as pl
from jax.experimental.pallas import tpu as pltpu


def _gaussian_loss_kernel(yhat_ref, y_ref, out_ref, *, tile_n, n_rows, need_mask):
    c = pl.program_id(0)   # row split (parallel across v7x's two TensorCores)
    i = pl.program_id(1)   # row block within the split (reduction axis)

    @pl.when(i == 0)
    def _():
        out_ref[...] = jnp.zeros_like(out_ref)

    mean = yhat_ref[:, 0, :].astype(jnp.float32)   # (tile_n, d), lane-aligned
    var = yhat_ref[:, 1, :].astype(jnp.float32)    # (tile_n, d), lane-aligned
    y = y_ref[...].astype(jnp.float32)             # (tile_n, d)

    diff = y - mean
    # 0.5*log(var) + (y-mean)^2/(2*var) == 0.5*(log(var) + diff^2/var)
    term = 0.5 * (jnp.log(var) + diff * diff / var)

    if need_mask:
        # Zero out rows past the true N (partial last block).
        row0 = (c * pl.num_programs(1) + i) * tile_n
        rows = row0 + jax.lax.broadcasted_iota(jnp.int32, (tile_n, 1), 0)
        term = jnp.where(rows < n_rows, term, 0.0)

    # Sublane-only reduction -> lane-shaped (1, d) partial, accumulated into
    # the resident f32 output block.  The single cross-lane reduce happens in
    # the wrapper, outside the hot loop.
    out_ref[...] += jnp.sum(term, axis=0, keepdims=True)[None]


def _choose_tile_n(n_rows: int, d: int) -> int:
    """~1 MiB of yhat per block (mem-bound sweet spot), multiple of 8, <= N."""
    target_bytes = 1 << 20
    rows = target_bytes // (2 * d * 4)
    rows = max(8, min(rows, 4096))
    rows = (rows // 8) * 8
    n_up8 = -(-n_rows // 8) * 8
    return max(8, min(rows, n_up8))


def gaussian_loss(yhat: jax.Array, y: jax.Array, *, tile_n: int | None = None) -> jax.Array:
    """Pallas implementation of GaussianLoss.forward(yhat, y) -> scalar (f32)."""
    n, two_d = yhat.shape
    d = two_d // 2
    assert two_d == 2 * d, "yhat must have an even number of columns"
    assert y.shape == (n, d), f"y shape {y.shape} incompatible with yhat {yhat.shape}"

    if tile_n is None:
        tile_n = _choose_tile_n(n, d)
    assert tile_n % 8 == 0 and tile_n >= 8, "tile_n must be a positive multiple of 8"

    row_blocks = -(-n // tile_n)
    # Split the row loop across v7x's two TensorCores when it divides evenly
    # (harmless on single-core v5e / v6e: it just runs both halves in turn).
    num_splits = 2 if (row_blocks >= 2 and row_blocks % 2 == 0) else 1
    inner = row_blocks // num_splits
    need_mask = (row_blocks * tile_n != n)

    yhat_r = yhat.reshape(n, 2, d)   # free: row-major contiguous

    kernel = functools.partial(
        _gaussian_loss_kernel, tile_n=tile_n, n_rows=n, need_mask=need_mask
    )

    partials = pl.pallas_call(
        kernel,
        out_shape=jax.ShapeDtypeStruct((num_splits, 1, d), jnp.float32),
        grid_spec=pltpu.PrefetchScalarGridSpec(
            num_scalar_prefetch=0,
            grid=(num_splits, inner),
            in_specs=[
                pl.BlockSpec((tile_n, 2, d), lambda c, i: (c * inner + i, 0, 0)),
                pl.BlockSpec((tile_n, d), lambda c, i: (c * inner + i, 0)),
            ],
            out_specs=pl.BlockSpec((1, 1, d), lambda c, i: (c, 0, 0)),
        ),
        compiler_params=pltpu.CompilerParams(
            dimension_semantics=("parallel", "arbitrary"),
        ),
    )(yhat_r, y)

    # Tiny final cross-lane reduce + mean normalization (done once, in XLA).
    return jnp.sum(partials) / (n * d)


def _reference_gaussian_loss(yhat, y):
    d = yhat.shape[1] // 2
    mean = yhat[:, :d]
    variance = yhat[:, d:]
    term1 = jnp.log(variance) / 2.0
    term2 = (y - mean) ** 2 / (variance * 2.0)
    return jnp.mean(term1 + term2)


def _make_inputs(key, n, d):
    k_mean, k_var, k_y = jax.random.split(key, 3)
    est_mean = jax.random.normal(k_mean, (n, d), dtype=jnp.float32)
    # positive variances, bounded away from zero (as the module assumes)
    est_var = jax.random.uniform(
        k_var, (n, d), dtype=jnp.float32, minval=0.5, maxval=1.5
    ) + 1e-3
    yhat = jnp.concatenate([est_mean, est_var], axis=1)
    y = jax.random.normal(k_y, (n, d), dtype=jnp.float32)
    return yhat, y


if __name__ == "__main__":
    key = jax.random.PRNGKey(0)
    k1, k2, k3 = jax.random.split(key, 3)

    # 1) Small shape matching the module contract: yhat (8, 64), y (8, 32).
    yhat, y = _make_inputs(k1, 8, 32)
    loss = gaussian_loss(yhat, y)
    jax.block_until_ready(loss)
    ref = _reference_gaussian_loss(yhat, y)
    assert jnp.allclose(loss, ref, atol=1e-5, rtol=1e-4), (loss, ref)

    # 2) Ragged row count (exercises the in-kernel tail mask).
    yhat2, y2 = _make_inputs(k2, 13, 40)
    loss2 = gaussian_loss(yhat2, y2)
    jax.block_until_ready(loss2)
    ref2 = _reference_gaussian_loss(yhat2, y2)
    assert jnp.allclose(loss2, ref2, atol=1e-5, rtol=1e-4), (loss2, ref2)

    # 3) Multiple row blocks + the 2-way parallel split (v7x megacore path).
    yhat3, y3 = _make_inputs(k3, 64, 32)
    loss3 = gaussian_loss(yhat3, y3, tile_n=16)
    jax.block_until_ready(loss3)
    ref3 = _reference_gaussian_loss(yhat3, y3)
    assert jnp.allclose(loss3, ref3, atol=1e-5, rtol=1e-4), (loss3, ref3)

    print("KERNEL_OK")
</pallas_src>

<mosaic_0001>
module attributes {stable_mosaic.version = 11 : i64} {
  func.func @_gaussian_loss_kernel(%arg0: i32, %arg1: i32, %arg2: memref<8x2x32xf32, #tpu.memory_space<vmem>>, %arg3: memref<8x32xf32, #tpu.memory_space<vmem>>, %arg4: memref<1x1x32xf32, #tpu.memory_space<vmem>>) attributes {dimension_semantics = [#tpu.dimension_semantics<parallel>, #tpu.dimension_semantics<arbitrary>], iteration_bounds = array<i64: 1, 1>, scalar_prefetch = 0 : i64, scratch_operands = 0 : i64, tpu.core_type = #tpu.core_type<tc>, window_params = [{transform_indices = @transform_0, window_bounds = array<i64: 8, 2, 32>}, {transform_indices = @transform_1, window_bounds = array<i64: 8, 32>}, {transform_indices = @transform_2, window_bounds = array<i64: 1, 1, 32>}]} {
    %c0_i32 = arith.constant 0 : i32
    %0 = arith.cmpi eq, %arg1, %c0_i32 : i32
    %1 = arith.extui %0 : i1 to i32
    %c0_i32_0 = arith.constant 0 : i32
    %2 = arith.cmpi ne, %1, %c0_i32_0 : i32
    scf.if %2 {
      %cst_14 = arith.constant 0.000000e+00 : f32
      %21 = vector.broadcast %cst_14 : f32 to vector<1x1x32xf32>
      %c0_15 = arith.constant 0 : index
      %c0_16 = arith.constant 0 : index
      %c0_17 = arith.constant 0 : index
      %22 = vector.load %arg4[%c0_15, %c0_16, %c0_17] : memref<1x1x32xf32, #tpu.memory_space<vmem>>, vector<1x1x32xf32>
      tpu.vector_store %arg4[%c0_15, %c0_16, %c0_17], %21 {strides = array<i32>} : memref<1x1x32xf32, #tpu.memory_space<vmem>>, vector<1x1x32xf32>,
    } else {
    }
    %c0 = arith.constant 0 : index
    %c0_1 = arith.constant 0 : index
    %c0_2 = arith.constant 0 : index
    %3 = vector.load %arg2[%c0, %c0_1, %c0_2] : memref<8x2x32xf32, #tpu.memory_space<vmem>>, vector<8x1x32xf32>
    %4 = vector.shape_cast %3 : vector<8x1x32xf32> to vector<8x32xf32>
    %c0_3 = arith.constant 0 : index
    %c1 = arith.constant 1 : index
    %c0_4 = arith.constant 0 : index
    %5 = vector.load %arg2[%c0_3, %c1, %c0_4] : memref<8x2x32xf32, #tpu.memory_space<vmem>>, vector<8x1x32xf32>
    %6 = vector.shape_cast %5 : vector<8x1x32xf32> to vector<8x32xf32>
    %c0_5 = arith.constant 0 : index
    %c0_6 = arith.constant 0 : index
    %7 = vector.load %arg3[%c0_5, %c0_6] : memref<8x32xf32, #tpu.memory_space<vmem>>, vector<8x32xf32>
    %8 = arith.subf %7, %4 : vector<8x32xf32>
    %9 = math.log %6 : vector<8x32xf32>
    %10 = arith.mulf %8, %8 : vector<8x32xf32>
    %11 = arith.divf %10, %6 : vector<8x32xf32>
    %12 = arith.addf %9, %11 : vector<8x32xf32>
    %cst = arith.constant 5.000000e-01 : f32
    %13 = vector.broadcast %cst : f32 to vector<8x32xf32>
    %14 = arith.mulf %13, %12 : vector<8x32xf32>
    %c0_7 = arith.constant 0 : index
    %c0_8 = arith.constant 0 : index
    %c0_9 = arith.constant 0 : index
    %15 = vector.load %arg4[%c0_7, %c0_8, %c0_9] : memref<1x1x32xf32, #tpu.memory_space<vmem>>, vector<1x1x32xf32>
    %cst_10 = arith.constant dense<0.000000e+00> : vector<32xf32>
    %16 = vector.multi_reduction <add>, %14, %cst_10 [0] : vector<8x32xf32> to vector<32xf32>
    %17 = vector.shape_cast %16 : vector<32xf32> to vector<1x32xf32>
    %18 = vector.shape_cast %17 : vector<1x32xf32> to vector<1x1x32xf32>
    %19 = arith.addf %15, %18 : vector<1x1x32xf32>
    %c0_11 = arith.constant 0 : index
    %c0_12 = arith.constant 0 : index
    %c0_13 = arith.constant 0 : index
    %20 = vector.load %arg4[%c0_11, %c0_12, %c0_13] : memref<1x1x32xf32, #tpu.memory_space<vmem>>, vector<1x1x32xf32>
    tpu.vector_store %arg4[%c0_11, %c0_12, %c0_13], %19 {strides = array<i32>} : memref<1x1x32xf32, #tpu.memory_space<vmem>>, vector<1x1x32xf32>,
    return
  }
  func.func @transform_0(%arg0: i32, %arg1: i32) -> (i32, i32, i32) {
    %c1_i32 = arith.constant 1 : i32
    %0 = arith.muli %arg0, %c1_i32 : i32
    %1 = arith.addi %0, %arg1 : i32
    %c0_i32 = arith.constant 0 : i32
    %c0_i32_0 = arith.constant 0 : i32
    %c0_i32_1 = arith.constant 0 : i32
    return %1, %c0_i32, %c0_i32_0 : i32, i32, i32
  }
  func.func @transform_1(%arg0: i32, %arg1: i32) -> (i32, i32) {
    %c1_i32 = arith.constant 1 : i32
    %0 = arith.muli %arg0, %c1_i32 : i32
    %1 = arith.addi %0, %arg1 : i32
    %c0_i32 = arith.constant 0 : i32
    %c0_i32_0 = arith.constant 0 : i32
    return %1, %c0_i32 : i32, i32
  }
  func.func @transform_2(%arg0: i32, %arg1: i32) -> (i32, i32, i32) {
    %c0_i32 = arith.constant 0 : i32
    %c0_i32_0 = arith.constant 0 : i32
    %c0_i32_1 = arith.constant 0 : i32
    return %arg0, %c0_i32, %c0_i32_0 : i32, i32, i32
  }
}

</mosaic_0001>

<bundles_post_ra>
// kernel: tpu_custom_call.1
= control target key start
LH: loop header
LB: loop body
LE: loop exit
PB: predicated region body
PF: predicated region fallthrough
CT: control target
= control target key end

     0   :  { %7 = vsyncpa [#allocation3], 0  ;;  %s403_s0 = inlined_call_operand.hbm [shape: f32[8,2,32], index: 0, kind: input, shape index: {}]   ;;  %s404_s1 = inlined_call_operand.hbm [shape: f32[8,32], index: 1, kind: input, shape index: {}]   ;;  %s405_s2 = inlined_call_operand.hbm [shape: f32[1,1,32], index: 2, kind: output, shape index: {}]  }
   0x1   :  { %8 = vsyncpa [#allocation6], 0 }
   0x2   :  { %9 = vsyncpa [#allocation4], 0  ;;  %s323_s9 = smov [#allocation2]   ;;  %s251_s13 = scalar_lea.hbm %s403_s0, 256 }
   0x3   :  { %s19_s10 = sshll.u32 %s323_s9, 4  ;;  %p252_p0 = scmp.ne.s32.totalorder %s403_s0, %s251_s13  ;;  %s20_s10 = int_to_ptr.vmem [resolvable:$true] %s19_s10 }
   0x4   :  { %p255_p1 = scmp.lt.u32.totalorder %s251_s13, %s403_s0 }
   0x6   :  { %p257_p2 = pnand %p255_p1, %p252_p0 }
   0x8   :  { %260 = shalt.err (!%p257_p2)
}
   0x9   :  { %s261_s18 = scalar_lea.vmem %s20_s10, 256  ;;  %p266_p4 = scmp.lt.s32.totalorder %s20_s10, %s20_s10 }
   0xa   :  { %p262_p3 = scmp.ne.s32.totalorder %s20_s10, %s261_s18  ;;  %p267_p5 = scmp.lt.s32.totalorder %s261_s18, %s261_s18 }
   0xc   :  { %p268_p6 = por %p267_p5, %p266_p4 }
   0xe   :  { %p269_p7 = pnand %p268_p6, %p262_p3 }
  0x10   :  { %272 = shalt.err (!%p269_p7)
}
  0x11   :  { %s324_s19 = smov 32   ;;  %s325_s20 = smov 2  }
  0x12   :  { %25 = dma.hbm_to_vmem [thread:$0]  %s403_s0, 256, %s20_s10, [#allocation3], %s324_s19, %s324_s19, %s325_s20  }
  0x13   :  { %s326_s23 = smov [#allocation5]   ;;  %s273_s27 = scalar_lea.hbm %s404_s1, 128 }
  0x14   :  { %s35_s24 = sshll.u32 %s326_s23, 4  ;;  %p274_p8 = scmp.ne.s32.totalorder %s404_s1, %s273_s27  ;;  %s36_s24 = int_to_ptr.vmem [resolvable:$true] %s35_s24 }
  0x15   :  { %p277_p9 = scmp.lt.u32.totalorder %s273_s27, %s404_s1 }
  0x17   :  { %p279_p10 = pnand %p277_p9, %p274_p8 }
  0x19   :  { %282 = shalt.err (!%p279_p10)
}
  0x1a   :  { %s283_s4 = scalar_lea.vmem %s36_s24, 128  ;;  %p288_p12 = scmp.lt.s32.totalorder %s36_s24, %s36_s24 }
  0x1b   :  { %p284_p11 = scmp.ne.s32.totalorder %s36_s24, %s283_s4  ;;  %p289_p13 = scmp.lt.s32.totalorder %s283_s4, %s283_s4 }
  0x1d   :  { %p290_p0 = por %p289_p13, %p288_p12 }
  0x1f   :  { %p291_p1 = pnand %p290_p0, %p284_p11 }
  0x21   :  { %294 = shalt.err (!%p291_p1)
}
  0x22   :  { %38 = dma.hbm_to_vmem [thread:$0]  %s404_s1, 128, %s36_s24, [#allocation6]  }
  0x23   :  { %317 = dma.done.wait [#allocation3], 256  }
  0x24   :  { %318 = vsyncadd [#allocation3], 4294967040 }
  0x25   :  { %319 = dma.done.wait [#allocation6], 128  }
  0x26   :  { %320 = vsyncadd [#allocation6], 4294967168  ;;  %vm52_vm0 = vcmask 253952   ;;  %v327_v0 = vmov 0.0   ;;  %vm80_vm1 = vcmask 1041409   ;;  %vm83_vm2 = vcmask 1042434  }
  0x27   :  { %53 = vst.msk [vmem:[#allocation7] sm:$0x1] %vm52_vm0, %v327_v0  ;;  %vm86_vm3 = vcmask 1043459   ;;  %vm89_vm4 = vcmask 1044484   ;;  %v54_v1 = vld [vmem:[#allocation2] sm:$0x1] }
  0x28   :  { %v55_v2 = vld [vmem:[#allocation2 + $0x2] sm:$0x1]  ;;  %v56_v3 = vld [vmem:[#allocation2 + $0x4] sm:$0x1]  ;;  %v57_v4 = vld [vmem:[#allocation2 + $0x6] sm:$0x1] }
  0x29   :  { %v58_v5 = vld [vmem:[#allocation2 + $0x8] sm:$0x1]  ;;  %v59_v6 = vld [vmem:[#allocation2 + $0xa] sm:$0x1]  ;;  %v62_v7 = vld [vmem:[#allocation2 + $0x1] sm:$0x1] }
  0x2a   :  { %v63_v8 = vld [vmem:[#allocation2 + $0x3] sm:$0x1]  ;;  %v64_v9 = vld [vmem:[#allocation2 + $0x5] sm:$0x1]  ;;  %v65_v10 = vld [vmem:[#allocation2 + $0x7] sm:$0x1]  ;;  %233 = vlog2.f32 %v62_v7 }
  0x2b   :  { %v66_v11 = vld [vmem:[#allocation2 + $0x9] sm:$0x1]  ;;  %v79_v12 = vrot.slane %v55_v2, 7  ;;  %v82_v13 = vrot.slane %v56_v3, 6  ;;  %v85_v14 = vrot.slane %v57_v4, 5  ;;  %vm92_vm5 = vcmask 1045509  }
  0x2c   :  { %v60_v15 = vld [vmem:[#allocation2 + $0xc] sm:$0x1]  ;;  %v67_v16 = vld [vmem:[#allocation2 + $0xb] sm:$0x1]  ;;  %v88_v17 = vrot.slane %v58_v5, 4  ;;  %vm95_vm6 = vcmask 1046534   ;;  %235 = vlog2.f32 %v63_v8 }
  0x2d   :  { %v68_v18 = vld [vmem:[#allocation2 + $0xd] sm:$0x1]  ;;  %v81_v19 = vsel %vm80_vm1, %v79_v12, %v54_v1  ;;  %v91_v20 = vrot.slane %v59_v6, 3  ;;  %v127_v21 = vrot.slane %v63_v8, 7  ;;  %v129_v22 = vrot.slane %v64_v9, 6  ;;  %v70_v45 = vld [vmem:[#allocation5] sm:$0xff] }
  0x2e   :  { %v69_v23 = vld [vmem:[#allocation2 + $0xf] sm:$0x1]  ;;  %v84_v24 = vsel %vm83_vm2, %v82_v13, %v81_v19  ;;  %v131_v25 = vrot.slane %v65_v10, 5  ;;  %v133_v26 = vrot.slane %v66_v11, 4  ;;  %v61_v27 = vld [vmem:[#allocation2 + $0xe] sm:$0x1]  ;;  %237 = vlog2.f32 %v64_v9 }
  0x2f   :  { %v87_v28 = vsel %vm86_vm3, %v85_v14, %v84_v24  ;;  %v94_v29 = vrot.slane %v60_v15, 2  ;;  %v128_v30 = vsel %vm80_vm1, %v127_v21, %v62_v7  ;;  %v135_v31 = vrot.slane %v67_v16, 3  ;;  %s328_s1 = smov [#allocation7]  }
  0x30   :  { %v90_v32 = vsel %vm89_vm4, %v88_v17, %v87_v28  ;;  %v130_v33 = vsel %vm83_vm2, %v129_v22, %v128_v30  ;;  %v137_v34 = vrot.slane %v68_v18, 2  ;;  %239 = vlog2.f32 %v65_v10  ;;  %s217_s6 = sshll.u32 %s328_s1, 4  ;;  %s218_s6 = int_to_ptr.vmem [resolvable:$true] %s217_s6 }
  0x31   :  { %v93_v35 = vsel %vm92_vm5, %v91_v20, %v90_v32  ;;  %v132_v36 = vsel %vm86_vm3, %v131_v25, %v130_v33  ;;  %v139_v37 = vrot.slane %v69_v23, 1  ;;  %v97_v38 = vrot.slane %v61_v27, 1  ;;  %s295_s7 = scalar_lea.vmem %s218_s6, 16  ;;  %s299_s8 = scalar_lea.vmem %s218_s6, 32 }
  0x32   :  { %vm98_vm7 = vcmask 1047559   ;;  %241 = vlog2.f32 %v66_v11  ;;  %v134_v39 = vsel %vm89_vm4, %v133_v26, %v132_v36  ;;  %v96_v40 = vsel %vm95_vm6, %v94_v29, %v93_v35  ;;  %p296_p2 = scmp.ne.s32.totalorder %s218_s6, %s295_s7  ;;  %p300_p3 = scmp.lt.s32.totalorder %s218_s6, %s218_s6 }
  0x33   :  { %243 = vlog2.f32 %v67_v16  ;;  %v136_v41 = vsel %vm92_vm5, %v135_v31, %v134_v39  ;;  %v99_v46 = vsel %vm98_vm7, %v97_v38, %v96_v40  ;;  %vm200_vm8 = vcmask 261120   ;;  %p301_p4 = scmp.lt.s32.totalorder %s299_s8, %s295_s7 }
  0x34   :  { %245 = vlog2.f32 %v68_v18  ;;  %v138_v42 = vsel %vm95_vm6, %v137_v34, %v136_v41  ;;  %v234_v44 = vpop.eup %233  ;;  %v101_v48 = vsub.f32 %v70_v45, %v99_v46  ;;  %v176_v45 = vld [vmem:[#allocation7] sm:$0x1] }
  0x35   :  { %247 = vlog2.f32 %v69_v23  ;;  %v140_v43 = vsel %vm98_vm7, %v139_v37, %v138_v42  ;;  %v103_v57 = vmul.f32 0.6931472, %v234_v44  ;;  %p302_p5 = por %p301_p4, %p300_p3 }
  0x36   :  { %249 = vrcp.f32 %v140_v43  ;;  %v236_v47 = vpop.eup %235  ;;  %v118_v53 = vmul.f32 %v101_v48, %v101_v48 }
  0x37   :  { %v105_v58 = vmul.f32 0.6931472, %v236_v47  ;;  %p303_p6 = pnand %p302_p5, %p296_p2 }
  0x38   :  { %v238_v49 = vpop.eup %237 }
  0x39   :  { %v107_v59 = vmul.f32 0.6931472, %v238_v49 }
  0x3a   :  { %v240_v50 = vpop.eup %239 }
  0x3b   :  { %v109_v60 = vmul.f32 0.6931472, %v240_v50 }
  0x3c   :  { %v242_v51 = vpop.eup %241 }
  0x3d   :  { %v244_v52 = vpop.eup %243  ;;  %v111_v61 = vmul.f32 0.6931472, %v242_v51 }
  0x3e   :  { %v246_v54 = vpop.eup %245  ;;  %v113_v63 = vmul.f32 0.6931472, %v244_v52 }
  0x3f   :  { %v248_v55 = vpop.eup %247  ;;  %v115_v0 = vmul.f32 0.6931472, %v246_v54 }
  0x40   :  { %v250_v56 = vpop.eup %249  ;;  %v117_v1 = vmul.f32 0.6931472, %v248_v55 }
  0x41   :  { %v143_v62 = vmul.f32 %v250_v56, %v118_v53 }
  0x43   :  { %v145_v2 = vrot.slane %v143_v62, 1  ;;  %v146_v3 = vrot.slane %v143_v62, 2  ;;  %v147_v4 = vrot.slane %v143_v62, 3  ;;  %v148_v5 = vrot.slane %v143_v62, 4 }
  0x44   :  { %v149_v6 = vrot.slane %v143_v62, 5  ;;  %v150_v7 = vrot.slane %v143_v62, 6  ;;  %v151_v8 = vrot.slane %v143_v62, 7  ;;  %v160_v9 = vadd.f32 %v143_v62, %v103_v57 }
  0x45   :  { %v161_v10 = vadd.f32 %v145_v2, %v105_v58  ;;  %v162_v11 = vadd.f32 %v146_v3, %v107_v59  ;;  %v163_v12 = vadd.f32 %v147_v4, %v109_v60  ;;  %v164_v13 = vadd.f32 %v148_v5, %v111_v61 }
  0x46   :  { %v165_v14 = vadd.f32 %v149_v6, %v113_v63  ;;  %v166_v15 = vadd.f32 %v150_v7, %v115_v0  ;;  %v167_v16 = vadd.f32 %v151_v8, %v117_v1  ;;  %v168_v17 = vmul.f32 0.5, %v160_v9 }
  0x47   :  { %v169_v18 = vmul.f32 0.5, %v161_v10  ;;  %v170_v19 = vmul.f32 0.5, %v162_v11  ;;  %v171_v20 = vmul.f32 0.5, %v163_v12  ;;  %v172_v21 = vmul.f32 0.5, %v164_v13 }
  0x48   :  { %v173_v22 = vmul.f32 0.5, %v165_v14  ;;  %v174_v23 = vmul.f32 0.5, %v166_v15  ;;  %v175_v24 = vmul.f32 0.5, %v167_v16 }
  0x49   :  { %v185_v25 = vrot.slane %v169_v18, 7  ;;  %v187_v26 = vrot.slane %v170_v19, 6  ;;  %v189_v27 = vrot.slane %v171_v20, 5  ;;  %v191_v28 = vrot.slane %v172_v21, 4 }
  0x4a   :  { %v193_v30 = vrot.slane %v173_v22, 3  ;;  %v195_v32 = vrot.slane %v174_v23, 2  ;;  %v197_v34 = vrot.slane %v175_v24, 1 }
  0x4b   :  { %v186_v29 = vsel %vm80_vm1, %v185_v25, %v168_v17 }
  0x4c   :  { %v188_v31 = vsel %vm83_vm2, %v187_v26, %v186_v29 }
  0x4d   :  { %v190_v33 = vsel %vm86_vm3, %v189_v27, %v188_v31 }
  0x4e   :  { %v192_v35 = vsel %vm89_vm4, %v191_v28, %v190_v33 }
  0x4f   :  { %v194_v36 = vsel %vm92_vm5, %v193_v30, %v192_v35 }
  0x50   :  { %v196_v37 = vsel %vm95_vm6, %v195_v32, %v194_v36 }
  0x51   :  { %v198_v38 = vsel %vm98_vm7, %v197_v34, %v196_v37 }
  0x52   :  { %v201_v39 = vsel %vm200_vm8, %v198_v38, 0.0 }
  0x53   :  { %v202_v40 = vrot.slane %v201_v39, 4 }
  0x55   :  { %v203_v41 = vadd.f32 %v202_v40, %v201_v39 }
  0x57   :  { %v204_v42 = vrot.slane %v203_v41, 2 }
  0x59   :  { %v205_v43 = vadd.f32 %v204_v42, %v203_v41 }
  0x5b   :  { %v206_v44 = vrot.slane %v205_v43, 1 }
  0x5d   :  { %v207_v46 = vadd.f32 %v206_v44, %v205_v43 }
  0x5f   :  { %v208_v47 = vadd.f32 %v207_v46, %v176_v45 }
  0x61   :  { %210 = vst.msk [vmem:[#allocation7] sm:$0x1] %vm52_vm0, %v208_v47 }
  0x62   :  { %306 = shalt.err (!%p303_p6)
}
  0x63   :  { %s307_s11 = scalar_lea.hbm %s405_s2, 16 }
  0x64   :  { %p308_p7 = scmp.ne.s32.totalorder %s405_s2, %s307_s11  ;;  %p311_p8 = scmp.lt.u32.totalorder %s307_s11, %s405_s2 }
  0x66   :  { %p313_p9 = pnand %p311_p8, %p308_p7 }
  0x68   :  { %316 = shalt.err (!%p313_p9)
}
  0x69   :  { %220 = dma.vmem_to_hbm [thread:$0]  %s218_s6, 16, %s405_s2, [#allocation4]  }
  0x6a   :  { %321 = dma.done.wait [#allocation4], 16  }
  0x6b   :  { %322 = vsyncadd [#allocation4], 4294967280 }
  0x6c   :  { %224 = vsyncpa [#allocation3], 1 }
  0x6d   :  { %225 = vsyncpa [#allocation6], 1 }
  0x6e   :  { %226 = vsyncpa [#allocation4], 1 }

</bundles_post_ra>
